<compile_context>
chip_gen: v7x
topology: tpu7x:2x2x1
jax: 0.10.0
libtpu: 0.0.40
codegen_flags: <defaults>
</compile_context>

<pallas_src>
import functools
import math

import jax
import jax.numpy as jnp
from jax.experimental import pallas as pl
from jax.experimental.pallas import tpu as pltpu


# ------------------------- VMEM budget / tile plan ------------------------- #

def _vmem_budget_and_limit():
    """(tile_budget_bytes, vmem_limit_bytes), generation-aware but v7x-safe."""
    cap = None
    try:
        cap = getattr(pltpu.get_tpu_info(), "vmem_capacity_bytes", None)
    except Exception:
        cap = None
    if not cap:
        cap = 64 * 1024 * 1024  # conservative fallback: v7x per-TensorCore VMEM
    # Cap so we stay inside v7x's 64 MiB/TC even if `cap` reports per-chip
    # capacity, and leave headroom for Mosaic internals and the small
    # modulation / statistics buffers.  On v5e/v6e (128 MiB) this still gives
    # far bigger tiles than the 16/32 MiB scoped-VMEM defaults.
    limit = min(int(cap * 0.60), 56 * 1024 * 1024)
    budget = min(int(cap * 0.40), 44 * 1024 * 1024)
    return budget, limit


def _plan(B, T, C, itemsize, budget_bytes):
    """Return (mode, bb, tt, tc).

    mode == "onepass": full-T resident blocks of shape (bb, T, tc).
    mode == "twopass": T-tiled streaming (stats kernel + apply kernel),
                       blocks of shape (1, tt, C).
    """
    # Per-element live bytes: double-buffered input + output slabs, plus up to
    # two fp32 temps of the tile materialized inside the kernel (cast, x-mean).
    bpe = 2 * itemsize + 2 * itemsize + 8
    elem_budget = max(budget_bytes // bpe, 8 * 128)

    # Channel-tile candidates: full C first (fully contiguous HBM rows), then
    # lane-dense divisors of C (multiples of 128), descending.
    tcs = [C]
    if C % 128 == 0:
        tcs += [d for d in range(C - 128, 127, -128) if C % d == 0]

    for tc in tcs:
        if T * tc > elem_budget:
            continue
        n_ct = C // tc
        # Widen over batch so each grid step moves several MiB, but keep >= 2
        # grid steps when there are >= 2 units of work (v7x has 2 TCs).
        bb = 1
        max_bb = min(B, max(elem_budget // (T * tc), 1))
        for cand in range(max_bb, 0, -1):
            if B % cand != 0:
                continue
            if (B // cand) * n_ct >= 2 or B * n_ct < 2:
                bb = cand
                break
        return "onepass", bb, T, tc

    # Full-T slabs don't fit even at the narrowest channel tile: stream with a
    # T-tiled two-pass over full-C contiguous rows.
    max_tt = min(T, elem_budget // max(C, 1))
    max_tt = (max_tt // 8) * 8
    tt = None
    for cand in range(max_tt, 7, -8):
        if T % cand == 0:
            tt = cand
            break
    if tt is None:
        # TODO(synk): mask ragged T tiles; for now fall back to full-T blocks
        # and rely on the raised vmem limit.
        return "onepass", 1, T, C
    return "twopass", 1, tt, C


# ------------------------------ Pallas kernels ----------------------------- #

def _onepass_kernel(x_ref, mod_ref, o_ref, *, eps):
    # x_ref: (bb, T, tc); mod_ref: (bb, 2, tc) = [scale; shift]; o_ref like x.
    xf = x_ref[...].astype(jnp.float32)                        # (bb, T, tc)
    inv_t = 1.0 / x_ref.shape[1]
    mean = jnp.sum(xf, axis=1, keepdims=True) * inv_t          # (bb, 1, tc)
    d = xf - mean
    var = jnp.sum(d * d, axis=1, keepdims=True) * inv_t        # stable 2-pass
    inv_std = jax.lax.rsqrt(var + eps)
    a = inv_std * (mod_ref[:, 0:1, :].astype(jnp.float32) + 1.0)
    c = mod_ref[:, 1:2, :].astype(jnp.float32) - mean * a
    if o_ref.dtype == jnp.float32:
        o_ref[...] = xf * a + c
    else:
        # bf16 path: FMA in the storage dtype so no fp32 copy of the tile is
        # kept live for the store (pure VMEM/vreg-pressure win; mem-bound).
        cd = o_ref.dtype
        o_ref[...] = (x_ref[...] * a.astype(cd) + c.astype(cd)).astype(o_ref.dtype)


def _stats_kernel(x_ref, stat_ref, *, inv_total):
    # Streaming per-(b, c) mean / M2 over T tiles; Chan's parallel combination
    # keeps it cancellation-safe.  stat_ref (1, 2, C) is the resident
    # accumulator (same output block across the T grid axis).
    k = pl.program_id(1)
    x = x_ref[0].astype(jnp.float32)                           # (tt, C)
    n_b = float(x.shape[0])
    mean_b = jnp.mean(x, axis=0, keepdims=True)                # (1, C)
    d = x - mean_b
    m2_b = jnp.sum(d * d, axis=0, keepdims=True)               # (1, C)

    @pl.when(k == 0)
    def _():
        stat_ref[0, 0:1, :] = mean_b
        stat_ref[0, 1:2, :] = m2_b

    @pl.when(k > 0)
    def _():
        n_a = k.astype(jnp.float32) * n_b
        n_ab = n_a + n_b
        mean_a = stat_ref[0, 0:1, :]
        m2_a = stat_ref[0, 1:2, :]
        delta = mean_b - mean_a
        stat_ref[0, 0:1, :] = mean_a + delta * (n_b / n_ab)
        stat_ref[0, 1:2, :] = m2_a + m2_b + delta * delta * (n_a * (n_b / n_ab))

    @pl.when(k == pl.num_programs(1) - 1)
    def _():
        stat_ref[0, 1:2, :] = stat_ref[0, 1:2, :] * inv_total  # biased variance


def _apply_kernel(x_ref, ac_ref, o_ref):
    # y = x * a + c with precomputed fp32 a, c (ac_ref: (1, 2, C)).
    if o_ref.dtype == jnp.float32:
        o_ref[...] = x_ref[...] * ac_ref[:, 0:1, :] + ac_ref[:, 1:2, :]
    else:
        cd = o_ref.dtype
        o_ref[...] = (x_ref[...] * ac_ref[:, 0:1, :].astype(cd)
                      + ac_ref[:, 1:2, :].astype(cd)).astype(o_ref.dtype)


# --------------------------------- wrappers -------------------------------- #

def _adainsnorm_onepass(x, mod, *, eps, bb, tc, vmem_limit):
    B, T, C = x.shape
    kernel = functools.partial(_onepass_kernel, eps=eps)
    return pl.pallas_call(
        kernel,
        out_shape=jax.ShapeDtypeStruct((B, T, C), x.dtype),
        grid_spec=pltpu.PrefetchScalarGridSpec(
            num_scalar_prefetch=0,
            grid=(B // bb, C // tc),
            in_specs=[
                pl.BlockSpec((bb, T, tc), lambda i, j: (i, 0, j)),   # x
                pl.BlockSpec((bb, 2, tc), lambda i, j: (i, 0, j)),   # [scale;shift]
            ],
            out_specs=pl.BlockSpec((bb, T, tc), lambda i, j: (i, 0, j)),
        ),
        compiler_params=pltpu.CompilerParams(
            dimension_semantics=("parallel", "parallel"),
            vmem_limit_bytes=vmem_limit),
    )(x, mod)


def _adainsnorm_twopass(x, mod, *, eps, tt, vmem_limit):
    B, T, C = x.shape
    n_tt = T // tt

    stats = pl.pallas_call(
        functools.partial(_stats_kernel, inv_total=1.0 / T),
        out_shape=jax.ShapeDtypeStruct((B, 2, C), jnp.float32),
        grid_spec=pltpu.PrefetchScalarGridSpec(
            num_scalar_prefetch=0,
            grid=(B, n_tt),
            in_specs=[pl.BlockSpec((1, tt, C), lambda b, k: (b, k, 0))],
            out_specs=pl.BlockSpec((1, 2, C), lambda b, k: (b, 0, 0)),
        ),
        compiler_params=pltpu.CompilerParams(
            dimension_semantics=("parallel", "arbitrary"),
            vmem_limit_bytes=vmem_limit),
    )(x)

    # Fold stats + modulation into a single fp32 FMA (tiny (B, C) math in XLA).
    mean = stats[:, 0:1, :]
    var = stats[:, 1:2, :]
    inv_std = jax.lax.rsqrt(var + eps)
    a = inv_std * (1.0 + mod[:, 0:1, :].astype(jnp.float32))
    c = mod[:, 1:2, :].astype(jnp.float32) - mean * a
    ac = jnp.concatenate([a, c], axis=1)                        # (B, 2, C)

    return pl.pallas_call(
        _apply_kernel,
        out_shape=jax.ShapeDtypeStruct((B, T, C), x.dtype),
        grid_spec=pltpu.PrefetchScalarGridSpec(
            num_scalar_prefetch=0,
            grid=(B, n_tt),
            in_specs=[
                pl.BlockSpec((1, tt, C), lambda b, k: (b, k, 0)),
                pl.BlockSpec((1, 2, C), lambda b, k: (b, 0, 0)),
            ],
            out_specs=pl.BlockSpec((1, tt, C), lambda b, k: (b, k, 0)),
        ),
        compiler_params=pltpu.CompilerParams(
            dimension_semantics=("parallel", "parallel"),
            vmem_limit_bytes=vmem_limit),
    )(x, ac)


def adainsnorm_pallas(x, ss, *, eps=1e-5, budget_bytes=None):
    """x: (B, T, C); ss = Linear(SiLU(emb)): (B, 2*C) -> (B, T, C)."""
    B, T, C = x.shape
    mod = ss.reshape(B, 2, C)       # row 0 = scale, row 1 = shift (torch.chunk)
    budget, limit = _vmem_budget_and_limit()
    if budget_bytes is not None:    # test hook / override
        budget = budget_bytes
    mode, bb, tt, tc = _plan(B, T, C, jnp.dtype(x.dtype).itemsize, budget)
    if mode == "onepass":
        return _adainsnorm_onepass(x, mod, eps=eps, bb=bb, tc=tc, vmem_limit=limit)
    return _adainsnorm_twopass(x, mod, eps=eps, tt=tt, vmem_limit=limit)


# --------------------------------- JAX glue -------------------------------- #

def sinusoidal_pos_emb(t, num_steps, dim, rescale_steps=4000.0):
    """SinusoidalPosEmb.forward: t (B,) -> (B, dim)."""
    t = t.astype(jnp.float32) / float(num_steps) * float(rescale_steps)
    half_dim = dim // 2
    freqs = jnp.exp(
        jnp.arange(half_dim, dtype=jnp.float32)
        * -(math.log(10000.0) / (half_dim - 1)))
    emb = t[:, None] * freqs[None, :]
    return jnp.concatenate([jnp.sin(emb), jnp.cos(emb)], axis=-1)


def adainsnorm_forward(x, timestep, params, *, num_steps, eps=1e-5,
                       budget_bytes=None):
    """Full AdaInsNorm.forward (emb_type='adainsnorm_abs').

    The tiny SiLU+Linear over the timestep embedding is done once, batched, in
    plain XLA; the Pallas kernel(s) do the heavy streaming normalize+modulate
    over (B, T, C).
    """
    C = x.shape[-1]
    e = sinusoidal_pos_emb(timestep, num_steps, C)                 # (B, C)
    e = e * jax.nn.sigmoid(e)                                      # SiLU
    ss = jnp.dot(e, params["w"],
                 preferred_element_type=jnp.float32) + params["b"]  # (B, 2C)
    return adainsnorm_pallas(x, ss.astype(jnp.float32), eps=eps,
                             budget_bytes=budget_bytes)


def adainsnorm_reference(x, timestep, params, *, num_steps, eps=1e-5):
    """Pure-JAX reference mirroring the PyTorch module exactly."""
    C = x.shape[-1]
    e = sinusoidal_pos_emb(timestep, num_steps, C)
    e = e * jax.nn.sigmoid(e)
    ss = e @ params["w"] + params["b"]                             # (B, 2C)
    scale, shift = ss[:, None, :C], ss[:, None, C:]
    mean = jnp.mean(x, axis=1, keepdims=True)
    var = jnp.mean((x - mean) ** 2, axis=1, keepdims=True)
    xn = (x - mean) / jnp.sqrt(var + eps)
    return xn * (1.0 + scale) + shift


# ----------------------------------- main ---------------------------------- #

if __name__ == "__main__":
    DIFFUSION_STEPS = 100
    key = jax.random.PRNGKey(0)

    def make_case(key, B, T, C):
        kx, kt, kw, kb = jax.random.split(key, 4)
        x = jax.random.normal(kx, (B, T, C), dtype=jnp.float32)
        timestep = jax.random.randint(kt, (B,), 0, DIFFUSION_STEPS, jnp.int32)
        bound = 1.0 / math.sqrt(C)
        # PyTorch stores Linear weight as (2C, C) and computes e @ W.T + b;
        # we store W.T directly.
        w = jax.random.uniform(kw, (C, 2 * C), minval=-bound, maxval=bound,
                               dtype=jnp.float32)
        b = jax.random.uniform(kb, (2 * C,), minval=-bound, maxval=bound,
                               dtype=jnp.float32)
        return x, timestep, {"w": w, "b": b}

    # Case 1: toy shapes consistent with the module (B=2, T=8, n_embd=32).
    # Exercises the one-pass resident-tile kernel.
    k1, k2 = jax.random.split(key)
    x, timestep, params = make_case(k1, B=2, T=8, C=32)
    out = adainsnorm_forward(x, timestep, params, num_steps=DIFFUSION_STEPS)
    out = jax.block_until_ready(out)
    ref = adainsnorm_reference(x, timestep, params, num_steps=DIFFUSION_STEPS)
    assert out.shape == x.shape
    assert jnp.allclose(out, ref, atol=2e-5, rtol=2e-5), "one-pass mismatch"

    # Case 2: force the large-T streaming two-pass path (stats + apply
    # kernels) by shrinking the tile budget; validates the Chan-combined
    # running statistics against the reference.
    x2, ts2, params2 = make_case(k2, B=2, T=256, C=256)
    out2 = adainsnorm_forward(x2, ts2, params2, num_steps=DIFFUSION_STEPS,
                              budget_bytes=64 * 1024)
    out2 = jax.block_until_ready(out2)
    ref2 = adainsnorm_reference(x2, ts2, params2, num_steps=DIFFUSION_STEPS)
    assert jnp.allclose(out2, ref2, atol=2e-5, rtol=2e-5), "two-pass mismatch"

    print("KERNEL_OK")
</pallas_src>

<mosaic_0001>
module attributes {stable_mosaic.version = 11 : i64} {
  func.func @_onepass_kernel(%arg0: i32, %arg1: i32, %arg2: memref<1x8x32xf32, #tpu.memory_space<vmem>>, %arg3: memref<1x2x32xf32, #tpu.memory_space<vmem>>, %arg4: memref<1x8x32xf32, #tpu.memory_space<vmem>>) attributes {dimension_semantics = [#tpu.dimension_semantics<parallel>, #tpu.dimension_semantics<parallel>], iteration_bounds = array<i64: 2, 1>, scalar_prefetch = 0 : i64, scratch_operands = 0 : i64, tpu.core_type = #tpu.core_type<tc>, window_params = [{transform_indices = @transform_0, window_bounds = array<i64: 1, 8, 32>}, {transform_indices = @transform_1, window_bounds = array<i64: 1, 2, 32>}, {transform_indices = @transform_2, window_bounds = array<i64: 1, 8, 32>}]} {
    %c0 = arith.constant 0 : index
    %c0_0 = arith.constant 0 : index
    %c0_1 = arith.constant 0 : index
    %0 = vector.load %arg2[%c0, %c0_0, %c0_1] : memref<1x8x32xf32, #tpu.memory_space<vmem>>, vector<1x8x32xf32>
    %cst = arith.constant dense<0.000000e+00> : vector<1x32xf32>
    %1 = vector.multi_reduction <add>, %0, %cst [1] : vector<1x8x32xf32> to vector<1x32xf32>
    %2 = vector.shape_cast %1 : vector<1x32xf32> to vector<1x1x32xf32>
    %cst_2 = arith.constant 1.250000e-01 : f32
    %3 = vector.broadcast %cst_2 : f32 to vector<1x1x32xf32>
    %4 = arith.mulf %2, %3 : vector<1x1x32xf32>
    %5 = vector.broadcast %4 : vector<1x1x32xf32> to vector<1x8x32xf32>
    %6 = arith.subf %0, %5 : vector<1x8x32xf32>
    %7 = arith.mulf %6, %6 : vector<1x8x32xf32>
    %cst_3 = arith.constant dense<0.000000e+00> : vector<1x32xf32>
    %8 = vector.multi_reduction <add>, %7, %cst_3 [1] : vector<1x8x32xf32> to vector<1x32xf32>
    %9 = vector.shape_cast %8 : vector<1x32xf32> to vector<1x1x32xf32>
    %cst_4 = arith.constant 1.250000e-01 : f32
    %10 = vector.broadcast %cst_4 : f32 to vector<1x1x32xf32>
    %11 = arith.mulf %9, %10 : vector<1x1x32xf32>
    %cst_5 = arith.constant 9.99999974E-6 : f32
    %12 = vector.broadcast %cst_5 : f32 to vector<1x1x32xf32>
    %13 = arith.addf %11, %12 : vector<1x1x32xf32>
    %14 = math.rsqrt %13 : vector<1x1x32xf32>
    %c0_6 = arith.constant 0 : index
    %c0_7 = arith.constant 0 : index
    %c0_8 = arith.constant 0 : index
    %15 = vector.load %arg3[%c0_6, %c0_7, %c0_8] : memref<1x2x32xf32, #tpu.memory_space<vmem>>, vector<1x1x32xf32>
    %cst_9 = arith.constant 1.000000e+00 : f32
    %16 = vector.broadcast %cst_9 : f32 to vector<1x1x32xf32>
    %17 = arith.addf %15, %16 : vector<1x1x32xf32>
    %18 = arith.mulf %14, %17 : vector<1x1x32xf32>
    %c0_10 = arith.constant 0 : index
    %c1 = arith.constant 1 : index
    %c0_11 = arith.constant 0 : index
    %19 = vector.load %arg3[%c0_10, %c1, %c0_11] : memref<1x2x32xf32, #tpu.memory_space<vmem>>, vector<1x1x32xf32>
    %20 = arith.mulf %4, %18 : vector<1x1x32xf32>
    %21 = arith.subf %19, %20 : vector<1x1x32xf32>
    %22 = vector.broadcast %18 : vector<1x1x32xf32> to vector<1x8x32xf32>
    %23 = arith.mulf %0, %22 : vector<1x8x32xf32>
    %24 = vector.broadcast %21 : vector<1x1x32xf32> to vector<1x8x32xf32>
    %25 = arith.addf %23, %24 : vector<1x8x32xf32>
    %c0_12 = arith.constant 0 : index
    %c0_13 = arith.constant 0 : index
    %c0_14 = arith.constant 0 : index
    %26 = vector.load %arg4[%c0_12, %c0_13, %c0_14] : memref<1x8x32xf32, #tpu.memory_space<vmem>>, vector<1x8x32xf32>
    tpu.vector_store %arg4[%c0_12, %c0_13, %c0_14], %25 {strides = array<i32>} : memref<1x8x32xf32, #tpu.memory_space<vmem>>, vector<1x8x32xf32>,
    return
  }
  func.func @transform_0(%arg0: i32, %arg1: i32) -> (i32, i32, i32) {
    %c0_i32 = arith.constant 0 : i32
    %c0_i32_0 = arith.constant 0 : i32
    return %arg0, %c0_i32, %arg1 : i32, i32, i32
  }
  func.func @transform_1(%arg0: i32, %arg1: i32) -> (i32, i32, i32) {
    %c0_i32 = arith.constant 0 : i32
    %c0_i32_0 = arith.constant 0 : i32
    return %arg0, %c0_i32, %arg1 : i32, i32, i32
  }
  func.func @transform_2(%arg0: i32, %arg1: i32) -> (i32, i32, i32) {
    %c0_i32 = arith.constant 0 : i32
    %c0_i32_0 = arith.constant 0 : i32
    return %arg0, %c0_i32, %arg1 : i32, i32, i32
  }
}

</mosaic_0001>

<bundles_post_ra>
// kernel: tpu_custom_call.1
= control target key start
LH: loop header
LB: loop body
LE: loop exit
PB: predicated region body
PF: predicated region fallthrough
CT: control target
= control target key end

     0   :  { %7 = vsyncpa [#allocation3], 0  ;;  %s851_s0 = inlined_call_operand.hbm [shape: f32[2,8,32], index: 0, kind: input, shape index: {}]   ;;  %s852_s1 = inlined_call_operand.hbm [shape: f32[2,2,32], index: 1, kind: input, shape index: {}]   ;;  %s853_s2 = inlined_call_operand.hbm [shape: f32[2,8,32], index: 2, kind: output, shape index: {}]  }
   0x1   :  { %9 = vsyncpa [#allocation3 + $0x1], 0 }
   0x2   :  { %10 = vsyncpa [#allocation6], 0 }
   0x3   :  { %12 = vsyncpa [#allocation6 + $0x1], 0 }
   0x4   :  { %13 = vsyncpa [#allocation4], 0 }
   0x5   :  { %15 = vsyncpa [#allocation4 + $0x1], 0  ;;  %s625_s9 = smov 0   ;;  %s627_s10 = smov 0  }
   0x6   :  { %s629_s11 = smov 0   ;;  %s631_s12 = smov 0  }
   0x7   :  { %s633_s13 = smov 0   ;;  %s635_s14 = smov 0  }
   0x8 LB: > { %s374_s15 = sadd.s32 4294967295, %s605_s14   ;;  %s375_s16 = sadd.s32 4294967294, %s605_s14   ;;  %s605_s14 = sphi %s635_s14, %s21_s14   ;;  %s601_s13 = sphi %s633_s13, %s873_s13   ;;  %s597_s12 = sphi %s631_s12, %s872_s12   ;;  %s593_s11 = sphi %s629_s11, %s871_s11   ;;  %s589_s10 = sphi %s627_s10, %s870_s10   ;;  %s585_s9 = sphi %s625_s9, %s869_s9  }
   0x9   : > { %s33_s17 = sadd.s32 1, %s601_s13  ;;  %s42_s18 = sadd.s32 1, %s593_s11 }
   0xa   : > { %p35_p0 = scmp.ge.s32.totalorder %s33_s17, 2  ;;  %p49_p1 = scmp.ne.s32.totalorder %s593_s11, %s589_s10 }
   0xb   : > { %p50_p2 = scmp.eq.s32.totalorder %s605_s14, 0  ;;  %p55_p3 = scmp.ne.s32.totalorder %s589_s10, %s585_s9 }
   0xc   : > { %s875_s17 = smov (%p35_p0, %s33_s17), 0  ;;  %p56_p5 = scmp.eq.s32.totalorder %s374_s15, 0 }
   0xd   : > { %p666_p4 = por %p50_p2, %p49_p1  ;;  %s37_s20 = ssub.s32 %s601_s13, %s875_s17 }
   0xe   : > { %p109_p6 = scmp.eq.s32.totalorder %s374_s15, 1  ;;  %p40_p7 = scmp.eq.s32.totalorder %s37_s20, 0 }
   0xf   : > { %p672_p8 = por %p56_p5, %p55_p3  ;;  %p115_p10 = scmp.eq.s32.totalorder %s375_s16, 1 }
  0x10   : > { %p676_p9 = por %p109_p6, %p49_p1  ;;  %p407_p13 = scmp.lt.s32.totalorder %s605_s14, 2 }
  0x11   : > { %s857_s21 = scalar_select %p672_p8, 1, 0 }
  0x12   : > { %s858_s22 = scalar_select %p676_p9, 1, 0 }
  0x13   : > { %s681_s23 = scalar_select %p40_p7, %s593_s11, %s42_s18  }
  0x14   : > { %p683_p11 = por %p115_p10, %p55_p3  ;;  %s690_s25 = sand.u32 1, %s593_s11  }
  0x15   : > { %s378_s26 = sshll.u32 %s690_s25, 3  ;;  %s379_s27 = sshll.u32 %s601_s13, 7 }
  0x16   : > { %s859_s24 = scalar_select %p683_p11, 1, 0 }
  0x17   : > { %s697_s30 = scalar_lea.hbm %s851_s0, %s379_s27  ;;  %s139_s3 = scalar_lea.vmem [#allocation2], %s378_s26 }
  0x18   : > { %s147_s4 = sshll.u32 %s139_s3, 4  ;;  %p703_p0 = pnand %p407_p13, %p666_p4  ;;  %s699_s4 = int_to_ptr.vmem [resolvable:$true] %s147_s4 }
  0x19   : > { %s136_s6 = scalar_lea.sflag [#allocation3], %s690_s25  ;;  %s459_s7 = scalar_lea.hbm %s697_s30, 128 }
  0x1a   : > { %p460_p3 = scmp.ne.s32.totalorder %s697_s30, %s459_s7  ;;  %p461_p5 = pneg %p703_p0 }
  0x1b   : > { %s464_s16 = scalar_lea.hbm %s851_s0, 256  ;;  %p465_p4 = scmp.lt.u32.totalorder %s697_s30, %s851_s0 }
  0x1c   : > { %p462_p6 = pnand %p461_p5, %p460_p3  ;;  %p466_p10 = scmp.lt.u32.totalorder %s464_s16, %s459_s7 }
  0x1d   : > { %p468_p12 = scmp.lt.u32.totalorder %s459_s7, %s697_s30 }
  0x1e   : > { %p463_p7 = pneg %p462_p6  ;;  %p467_p13 = por %p466_p10, %p465_p4 }
  0x20   : > { %p469_p1 = por %p468_p12, %p467_p13 }
  0x22   : > { %p470_p2 = pnand %p469_p1, %p463_p7 }
  0x24   : > { %473 = shalt.err (!%p470_p2)
}
  0x25   : > { %s474_s20 = scalar_lea.vmem %s699_s4, 128  ;;  %s607_s26 = smov [#allocation2]  }
  0x26   : > { %p475_p3 = scmp.ne.s32.totalorder %s699_s4, %s474_s20  ;;  %s479_s27 = sshll.u32 %s607_s26, 4  ;;  %s480_s27 = int_to_ptr.vmem [resolvable:$false] %s479_s27 }
  0x27   : > { %s481_s28 = scalar_lea.vmem %s480_s27, 256  ;;  %p482_p9 = scmp.lt.s32.totalorder %s699_s4, %s480_s27 }
  0x28   : > { %p477_p6 = pnand %p475_p3, %p461_p5  ;;  %p483_p4 = scmp.lt.s32.totalorder %s481_s28, %s474_s20 }
  0x2a   : > { %p478_p11 = pneg %p477_p6  ;;  %p484_p10 = por %p483_p4, %p482_p9 }
  0x2c   : > { %p485_p12 = pnand %p484_p10, %p478_p11 }
  0x2e   : > { %488 = shalt.err (!%p485_p12)
}
  0x2f   : > { %399 = dma.hbm_to_vmem [thread:$0]  (!%p703_p0), %s697_s30, 128, %s699_s4, %s136_s6  }
  0x30   : > { %p861_p1 = scmp.lt.s32.totalorder %s605_s14, 3  ;;  %p862_p2 = scmp.ge.s32.totalorder %s605_s14, 1 }
  0x31   : > { %s380_s3 = sshll.u32 %s690_s25, 1  ;;  %s381_s7 = sshll.u32 %s601_s13, 5 }
  0x32   : > { %p739_p7 = pnand %p862_p2, %p861_p1  ;;  %s748_s16 = scalar_lea.hbm %s852_s1, %s381_s7 }
  0x33   : > { %s158_s18 = scalar_lea.vmem [#allocation5], %s380_s3  ;;  %s155_s30 = scalar_lea.sflag [#allocation6], %s690_s25 }
  0x34   : > { %s863_s29 = scalar_select %p739_p7, 1, 0 }
  0x35   : > { %s166_s19 = sshll.u32 %s158_s18, 4  ;;  %s489_s4 = scalar_lea.hbm %s748_s16, 32  ;;  %s167_s19 = int_to_ptr.vmem [resolvable:$true] %s166_s19 }
  0x36   : > { %p490_p9 = scmp.ne.s32.totalorder %s748_s16, %s489_s4  ;;  %s494_s26 = scalar_lea.hbm %s852_s1, 64 }
  0x37   : > { %p495_p3 = scmp.lt.u32.totalorder %s748_s16, %s852_s1  ;;  %p496_p6 = scmp.lt.u32.totalorder %s494_s26, %s489_s4 }
  0x38   : > { %p492_p11 = pnand %p490_p9, %p461_p5  ;;  %p498_p10 = scmp.lt.u32.totalorder %s489_s4, %s748_s16 }
  0x39   : > { %p497_p4 = por %p496_p6, %p495_p3 }
  0x3a   : > { %p493_p13 = pneg %p492_p11 }
  0x3b   : > { %p499_p12 = por %p498_p10, %p497_p4 }
  0x3d   : > { %p500_p1 = pnand %p499_p12, %p493_p13 }
  0x3f   : > { %503 = shalt.err (!%p500_p1)
}
  0x40   : > { %s504_s25 = scalar_lea.vmem %s167_s19, 32  ;;  %s608_s3 = smov [#allocation5]  }
  0x41   : > { %p505_p2 = scmp.ne.s32.totalorder %s167_s19, %s504_s25  ;;  %s509_s7 = sshll.u32 %s608_s3, 4  ;;  %s510_s7 = int_to_ptr.vmem [resolvable:$false] %s509_s7 }
  0x42   : > { %s511_s8 = scalar_lea.vmem %s510_s7, 64  ;;  %p512_p8 = scmp.lt.s32.totalorder %s167_s19, %s510_s7 }
  0x43   : > { %p507_p9 = pnand %p505_p2, %p461_p5  ;;  %p513_p7 = scmp.lt.s32.totalorder %s511_s8, %s504_s25 }
  0x45   : > { %p508_p11 = pneg %p507_p9  ;;  %p514_p3 = por %p513_p7, %p512_p8 }
  0x47   : > { %p515_p6 = pnand %p514_p3, %p508_p11 }
  0x49   : > { %518 = shalt.err (!%p515_p6)
}
  0x4a   : > { %402 = dma.hbm_to_vmem [thread:$0]  (!%p703_p0), %s748_s16, 32, %s167_s19, %s155_s30  }
  0x4b   : > { %p864_p13 = scmp.ne.s32.totalorder %s863_s29, 0 }
  0x4c   : > { %s773_s15 = sand.u32 (!%p864_p13), 1, %s589_s10   ;;  %p865_p8 = scmp.ne.s32.totalorder (!%p864_p13), %s857_s21, 0 }
  0x4d   : > { %175 = sbr.rel (%p864_p13) target bundleno = 160 (0xa0), region = 28  ;;  %s383_s18 = sshll.u32 (!%p864_p13), %s773_s15, 3 }
  0x4e   : > { %s178_s4 = scalar_lea.sflag (!%p864_p13), [#allocation3], %s773_s15  ;;  %s181_s6 = scalar_lea.vmem (!%p864_p13), [#allocation2], %s383_s18 }
  0x54   : > { %572 = dma.done.wait (%p865_p8), %s178_s4, 128  }
  0x55   : > { %574 = vsyncadd (%p865_p8), %s178_s4, 4294967168  ;;  %s384_s5 = sshll.u32 %s773_s15, 1  ;;  %s187_s29 = scalar_lea.sflag [#allocation6], %s773_s15 }
  0x56   : > { %s785_s16 = scalar_lea.vmem [#allocation5], %s384_s5 }
  0x57   : > { %576 = dma.done.wait (%p865_p8), %s187_s29, 32  }
  0x58   : > { %578 = vsyncadd (%p865_p8), %s187_s29, 4294967264  ;;  %vm217_vm0 = vcmask 261120   ;;  %v216_v0 = vld [vmem:[%s181_s6] sm:$0xff]  ;;  %v244_v20 = vlaneseq  ;;  %v238_v21 = vld [vmem:[%s785_s16] sm:$0x1]  ;;  %s215_s21 = scalar_lea.vmem [#allocation7], %s383_s18 }
  0x59   : > { %v218_v1 = vsel %vm217_vm0, %v216_v0, 0.0  ;;  %v239_v23 = vadd.f32 1.0, %v238_v21  ;;  %v241_v27 = vld [vmem:[%s785_s16 + $0x1] sm:$0x1]  ;;  %s270_s19 = sshll.u32 %s215_s21, 4  ;;  %s387_s30 = sshll.u32 %s597_s12, 7  ;;  %s798_s19 = int_to_ptr.vmem [resolvable:$true] %s270_s19 }
  0x5a   : > { %v219_v2 = vrot.slane %v218_v1, 4  ;;  %v245_v22 = vshrl.u32 %v244_v20, 7  ;;  %s803_s27 = scalar_lea.hbm %s853_s2, %s387_s30  ;;  %s256_s28 = scalar_lea.sflag [#allocation4], %s773_s15 }
  0x5b   : > { %s519_s25 = scalar_lea.vmem %s798_s19, 128  ;;  %p866_p5 = scmp.ne.s32.totalorder %s858_s22, 0 }
  0x5c   : > { %v220_v3 = vadd.f32 %v219_v2, %v218_v1  ;;  %v246_v24 = vsub.s32 0, %v245_v22  ;;  %p520_p0 = scmp.ne.s32.totalorder %s798_s19, %s519_s25  ;;  %s609_s12 = smov [#allocation7]  }
  0x5d   : > { %s523_s3 = sshll.u32 %s609_s12, 4  ;;  %s524_s3 = int_to_ptr.vmem [resolvable:$false] %s523_s3 }
  0x5e   : > { %v221_v4 = vrot.slane %v220_v3, 2  ;;  %p521_p7 = pnand %p520_p0, %p866_p5  ;;  %s525_s7 = scalar_lea.vmem %s524_s3, 256 }
  0x5f   : > { %p526_p10 = scmp.lt.s32.totalorder %s798_s19, %s524_s3  ;;  %p527_p12 = scmp.lt.s32.totalorder %s525_s7, %s519_s25 }
  0x60   : > { %v222_v5 = vadd.f32 %v221_v4, %v220_v3  ;;  %p522_p4 = pneg %p521_p7 }
  0x61   : > { %p528_p1 = por %p527_p12, %p526_p10 }
  0x62   : > { %v223_v6 = vrot.slane %v222_v5, 1 }
  0x63   : > { %p529_p2 = pnand %p528_p1, %p522_p4 }
  0x64   : > { %v224_v7 = vadd.f32 %v223_v6, %v222_v5 }
  0x66   : > { %v225_v8 = vmul.f32 0.125, %v224_v7 }
  0x68   : > { %v226_v9 = vsub.f32 %v216_v0, %v225_v8 }
  0x6a   : > { %v227_v10 = vmul.f32 %v226_v9, %v226_v9 }
  0x6c   : > { %v228_v11 = vsel %vm217_vm0, %v227_v10, 0.0 }
  0x6d   : > { %v229_v12 = vrot.slane %v228_v11, 4 }
  0x6f   : > { %v230_v13 = vadd.f32 %v229_v12, %v228_v11 }
  0x71   : > { %v231_v14 = vrot.slane %v230_v13, 2 }
  0x73   : > { %v232_v15 = vadd.f32 %v231_v14, %v230_v13 }
  0x75   : > { %v233_v16 = vrot.slane %v232_v15, 1 }
  0x77   : > { %v234_v17 = vadd.f32 %v233_v16, %v232_v15 }
  0x79   : > { %v235_v18 = vmul.f32 0.125, %v234_v17 }
  0x7b   : > { %v236_v19 = vadd.f32 1e-05, %v235_v18 }
  0x7d   : > { %457 = vrsqrt.f32 %v236_v19 }
  0x87   : > { %v458_v25 = vpop.eup %457 }
  0x88   : > { %v240_v26 = vmul.f32 %v458_v25, %v239_v23 }
  0x8a   : > { %v242_v28 = vmul.f32 %v240_v26, %v225_v8  ;;  %v247_v29 = vrot.slane %v240_v26, %v246_v24 }
  0x8c   : > { %v243_v30 = vsub.f32 %v241_v27, %v242_v28  ;;  %v248_v31 = vmul.f32 %v247_v29, %v216_v0 }
  0x8e   : > { %v252_v32 = vrot.slane %v243_v30, %v246_v24 }
  0x90   : > { %v253_v33 = vadd.f32 %v252_v32, %v248_v31 }
  0x92   : > { %254 = vst.msk [vmem:[%s215_s21] sm:$0xff] %vm217_vm0, %v253_v33 }
  0x93   : > { %532 = shalt.err (!%p529_p2)
}
  0x94   : > { %s533_s8 = scalar_lea.hbm %s803_s27, 128  ;;  %s537_s4 = scalar_lea.hbm %s853_s2, 256 }
  0x95   : > { %p534_p9 = scmp.ne.s32.totalorder %s803_s27, %s533_s8  ;;  %p538_p6 = scmp.lt.u32.totalorder %s803_s27, %s853_s2 }
  0x96   : > { %p539_p13 = scmp.lt.u32.totalorder %s537_s4, %s533_s8  ;;  %p541_p0 = scmp.lt.u32.totalorder %s533_s8, %s803_s27 }
  0x97   : > { %p535_p11 = pnand %p534_p9, %p866_p5 }
  0x98   : > { %p540_p8 = por %p539_p13, %p538_p6 }
  0x99   : > { %p536_p3 = pneg %p535_p11 }
  0x9a   : > { %p542_p7 = por %p541_p0, %p540_p8 }
  0x9c   : > { %p543_p4 = pnand %p542_p7, %p536_p3 }
  0x9e   : > { %546 = shalt.err (!%p543_p4)
}
  0x9f   : > { %394 = dma.vmem_to_hbm [thread:$0]  (%p866_p5), %s798_s19, 128, %s803_s27, %s256_s28  }
  0xa0 PF: > { %s282_s29 = sand.u32 1, %s585_s9   ;;  %p867_p10 = scmp.ne.s32.totalorder %s859_s24, 0 }
  0xa1   : > { %p868_p12 = scmp.ge.s32.totalorder %s605_s14, 2  ;;  %s283_s16 = scalar_lea.sflag [#allocation4], %s282_s29 }
  0xa3   : > { %p404_p1 = pnand %p868_p12, %p867_p10 }
  0xa5   : > { %580 = dma.done.wait (!%p404_p1), %s283_s16, 128  }
  0xa6   : > { %582 = vsyncadd (!%p404_p1), %s283_s16, 4294967168  ;;  %s21_s14 = sadd.s32 1, %s605_s14   ;;  %s869_s9 = smov %s589_s10 }
  0xa7   : > { %p18_p2 = scmp.ge.s32.totalorder %s21_s14, 4   ;;  %s870_s10 = smov %s593_s11 }
  0xa8   : > { %s871_s11 = smov %s681_s23  ;;  %s872_s12 = smov %s601_s13 }
  0xa9   : > { %s873_s13 = smov %s875_s17  ;;  %20 = sbr.rel (!%p18_p2) target bundleno = 8 (0x8), region = 86 }
  0xb0   :  { %288 = vsyncpa [#allocation3], 1 }
  0xb1   :  { %290 = vsyncpa [#allocation3 + $0x1], 1 }
  0xb2   :  { %291 = vsyncpa [#allocation6], 1 }
  0xb3   :  { %293 = vsyncpa [#allocation6 + $0x1], 1 }
  0xb4   :  { %294 = vsyncpa [#allocation4], 1 }
  0xb5   :  { %296 = vsyncpa [#allocation4 + $0x1], 1 }

</bundles_post_ra>
